<compile_context>
chip_gen: v7x
topology: tpu7x:2x2x1
jax: 0.10.0
libtpu: 0.0.40
codegen_flags: <defaults>
</compile_context>

<pallas_src>
import numpy as np
import jax
import jax.numpy as jnp
from jax.experimental import pallas as pl
from jax.experimental.pallas import tpu as pltpu

EPS = 1e-5


# ---------------------------------------------------------------------------
# host-side constant builders: zigzag coords + orthonormal DCT-II + fused matrix
# ---------------------------------------------------------------------------
def get_dct_vector_coords(r):
    dct_index = []
    for i in range(r):
        if i % 2 == 0:
            dct_index.extend([(i - j, j) for j in range(i + 1)])
        else:
            dct_index.extend([(j, i - j) for j in range(i + 1)])
    for i in range(r, 2 * r - 1):
        if i % 2 == 0:
            dct_index.extend([(i - j, j) for j in range(i - r + 1, r)])
        else:
            dct_index.extend([(j, i - j) for j in range(i - r + 1, r)])
    return np.asarray(dct_index)


def dct_matrix(n):
    # D @ v == torch_dct.dct(v, norm='ortho') (orthonormal DCT-II)
    k = np.arange(n, dtype=np.float64)[:, None]
    m = np.arange(n, dtype=np.float64)[None, :]
    d = np.sqrt(2.0 / n) * np.cos(np.pi * (2.0 * m + 1.0) * k / (2.0 * n))
    d[0, :] *= 1.0 / np.sqrt(2.0)
    return d.astype(np.float32)


def build_dct_zigzag_matrix(H, W, vec_dim):
    # Mt[i*W + j, k] = DH[xs_k, i] * DW[ys_k, j]  so that
    #   dct_2d(x, norm='ortho')[xs_k, ys_k] == (x.reshape(H*W) @ Mt)[k]
    # NOTE: like the reference, zigzag coords use r=H (assumes H == W).
    coords = get_dct_vector_coords(H)[:vec_dim]
    assert vec_dim <= H * W
    DH, DW = dct_matrix(H), dct_matrix(W)
    A = DH[coords[:, 0], :]                                   # (K, H)
    Bm = DW[coords[:, 1], :]                                  # (K, W)
    M = (A[:, :, None] * Bm[:, None, :]).reshape(vec_dim, H * W)
    return jnp.asarray(M.T)                                   # (H*W, K)


# ---------------------------------------------------------------------------
# parameter init + host-side folding into the kernel's weight layout
# ---------------------------------------------------------------------------
def _bn_scale(ch):
    # BatchNorm1d default init, eval mode: gamma=1, beta=0, mean=0, var=1
    # => y = x / sqrt(1 + eps); the shift is exactly 0 and is dropped.
    # TODO(synk): train-mode batch statistics / non-default BN params (nonzero
    #             shift) are not modeled here (would be an extra bias column).
    return np.full((ch,), 1.0 / np.sqrt(1.0 + EPS), np.float32)


def _block_diag_taps(w, batch):
    # w: PyTorch Conv1d weight (Cout, Cin, 3)  ->  (B*Cout, 3*B*Cin)
    # laid out to match the kernel's im2col stack [v(l-1); v(l); v(l+1)],
    # block-diagonal over the batch (rows/cols ordered b*C + c).
    Cout, Cin, _ = w.shape
    wt = jnp.transpose(w, (2, 0, 1))                          # (3, Cout, Cin)
    big = jnp.zeros((3, batch * Cout, batch * Cin), w.dtype)
    for b in range(batch):
        big = big.at[:, b * Cout:(b + 1) * Cout, b * Cin:(b + 1) * Cin].set(wt)
    return jnp.transpose(big, (1, 0, 2)).reshape(batch * Cout, 3 * batch * Cin)


def init_params(key, in_channels, mid_channels, out_channels, y_channels):
    k1, k2, k3 = jax.random.split(key, 3)
    # PyTorch Conv1d weight layout (Cout, Cin, 3), bias=False as in the reference.
    w1 = 0.1 * jax.random.normal(k1, (mid_channels, in_channels, 3), jnp.float32)
    w2 = 0.1 * jax.random.normal(k2, (in_channels, mid_channels, 3), jnp.float32)
    wup = 0.1 * jax.random.normal(
        k3, (out_channels, in_channels + y_channels, 3), jnp.float32)
    return dict(w1=w1, w2=w2, wup=wup)


def prepare_params(params, batch, in_channels, y_channels):
    # Fold eval-mode BN scale into the conv weights, flatten to im2col layout,
    # block-diagonalize over the batch.
    w1, w2, wup = params["w1"], params["w2"], params["wup"]
    s1 = jnp.asarray(_bn_scale(w1.shape[0]))[:, None, None]
    s2 = jnp.asarray(_bn_scale(w2.shape[0]))[:, None, None]
    s3 = jnp.asarray(_bn_scale(wup.shape[0]))[:, None, None]
    w1f = _block_diag_taps(w1 * s1, batch)                     # (B*mid, 3*B*C)
    w2f = _block_diag_taps(w2 * s2, batch)                     # (B*C,   3*B*mid)
    wupf = wup * s3
    wux = _block_diag_taps(wupf[:, :in_channels, :], batch)    # (B*out, 3*B*C)
    wuy = _block_diag_taps(wupf[:, in_channels:, :], batch)    # (B*out, 3*B*Cy)
    wu = jnp.concatenate([wux, wuy], axis=1)  # matches [stack(h); stack(y)] order
    return dict(w1=w1f, w2=w2f, wu=wu)


# ---------------------------------------------------------------------------
# the single fused Pallas kernel (no grid)
# ---------------------------------------------------------------------------
def _dct_block_kernel(xf_ref, mt_ref, y_ref, w1_ref, w2_ref, wu_ref, out_ref):
    L = out_ref.shape[-1]

    # Stage 1: fused 2-D ortho DCT + zigzag gather == ONE lane-dense matmul.
    # (B*C, H*W) @ (H*W, vec_dim) -> (B*C, vec_dim); rows b*C + c are already the
    # (channels-on-sublanes, sequence-on-lanes) layout the conv stage consumes.
    d = jnp.dot(xf_ref[...], mt_ref[...], preferred_element_type=jnp.float32)

    # Boundary masks, hoisted: built once, reused by every conv below.
    lane = jax.lax.broadcasted_iota(jnp.int32, (1, L), 1)
    not_first = lane != 0
    not_last = lane != L - 1

    def conv3_stack(v):
        # im2col for Conv1d(k=3, pad=1): stack [v(l-1); v(l); v(l+1)] on sublanes.
        v_m1 = jnp.where(not_first, jnp.roll(v, 1, axis=1), 0.0)
        v_p1 = jnp.where(not_last, jnp.roll(v, -1, axis=1), 0.0)
        return jnp.concatenate([v_m1, v, v_p1], axis=0)

    # Stage 2: conv1d -> BN -> ReLU, twice (BN scale pre-folded into weights).
    h = jnp.maximum(
        jnp.dot(w1_ref[...], conv3_stack(d), preferred_element_type=jnp.float32),
        0.0)
    h = jnp.maximum(
        jnp.dot(w2_ref[...], conv3_stack(h), preferred_element_type=jnp.float32),
        0.0)

    # Stage 3: cat([h, y], dim=channels) + upconv -> BN -> ReLU, as ONE matmul.
    s = jnp.concatenate([conv3_stack(h), conv3_stack(y_ref[...])], axis=0)
    out_ref[...] = jnp.maximum(
        jnp.dot(wu_ref[...], s, preferred_element_type=jnp.float32), 0.0)


def dct_block_forward(x, y, mt, prepped):
    B, C, H, W = x.shape
    L = mt.shape[1]                                   # vec_dim
    out_ch_b = prepped["wu"].shape[0]                 # B * out_channels
    xf = x.reshape(B * C, H * W).astype(jnp.float32)  # rows b*C + c
    yf = y.reshape(-1, L).astype(jnp.float32)         # (B*Cy, L), rows b*Cy + c

    vmem = pl.BlockSpec(memory_space=pltpu.MemorySpace.VMEM)
    out = pl.pallas_call(
        _dct_block_kernel,
        out_shape=jax.ShapeDtypeStruct((out_ch_b, L), jnp.float32),
        in_specs=[vmem] * 6,
        out_specs=vmem,
    )(xf, mt, yf, prepped["w1"], prepped["w2"], prepped["wu"])
    return out.reshape(B, out_ch_b // B, L)


# ---------------------------------------------------------------------------
if __name__ == "__main__":
    B, C, H, W = 2, 4, 16, 16
    mid_channels = 8
    y_channels = 4                       # cat([out, y], dim=1) -> up_channels
    out_channels = 8
    vec_dim = 128                        # <= H*W zigzag coefficients

    key = jax.random.PRNGKey(0)
    kx, ky, kp = jax.random.split(key, 3)
    x = jax.random.normal(kx, (B, C, H, W), jnp.float32)
    y = jax.random.normal(ky, (B, y_channels, vec_dim), jnp.float32)

    mt = build_dct_zigzag_matrix(H, W, vec_dim)
    params = init_params(kp, C, mid_channels, out_channels, y_channels)
    prepped = prepare_params(params, B, C, y_channels)

    fwd = jax.jit(dct_block_forward)
    out = jax.block_until_ready(fwd(x, y, mt, prepped))
    assert out.shape == (B, out_channels, vec_dim), out.shape
    assert out.dtype == jnp.float32
    print("KERNEL_OK")
</pallas_src>

<mosaic_0001>
module attributes {stable_mosaic.version = 11 : i64} {
  func.func @_dct_block_kernel(%arg0: memref<8x256xf32, #tpu.memory_space<vmem>>, %arg1: memref<256x128xf32, #tpu.memory_space<vmem>>, %arg2: memref<8x128xf32, #tpu.memory_space<vmem>>, %arg3: memref<16x24xf32, #tpu.memory_space<vmem>>, %arg4: memref<8x48xf32, #tpu.memory_space<vmem>>, %arg5: memref<16x48xf32, #tpu.memory_space<vmem>>, %arg6: memref<16x128xf32, #tpu.memory_space<vmem>>) attributes {dimension_semantics = [], scalar_prefetch = 0 : i64, scratch_operands = 0 : i64, tpu.core_type = #tpu.core_type<tc>} {
    %c0 = arith.constant 0 : index
    %c0_0 = arith.constant 0 : index
    %0 = vector.load %arg0[%c0, %c0_0] : memref<8x256xf32, #tpu.memory_space<vmem>>, vector<8x256xf32>
    %c0_1 = arith.constant 0 : index
    %c0_2 = arith.constant 0 : index
    %1 = vector.load %arg1[%c0_1, %c0_2] : memref<256x128xf32, #tpu.memory_space<vmem>>, vector<256x128xf32>
    %cst = arith.constant dense<0.000000e+00> : vector<8x128xf32>
    %2 = tpu.matmul %0, %1, %cst {dimension_numbers = #tpu.dot_dimension_numbers<[1], [0], [0], [1], [0, 0, 1, 1], [], []>} : vector<8x256xf32>, vector<256x128xf32>, vector<8x128xf32> -> vector<8x128xf32>
    %3 = tpu.iota {dimensions = array<i32: 1>} : vector<1x128xi32>
    %c0_i32 = arith.constant 0 : i32
    %4 = vector.broadcast %c0_i32 : i32 to vector<1x128xi32>
    %5 = arith.cmpi ne, %3, %4 : vector<1x128xi32>
    %c127_i32 = arith.constant 127 : i32
    %6 = vector.broadcast %c127_i32 : i32 to vector<1x128xi32>
    %7 = arith.cmpi ne, %3, %6 : vector<1x128xi32>
    %c0_3 = arith.constant 0 : index
    %c0_4 = arith.constant 0 : index
    %8 = vector.load %arg3[%c0_3, %c0_4] : memref<16x24xf32, #tpu.memory_space<vmem>>, vector<16x24xf32>
    %9 = vector.extract_strided_slice %2 {offsets = [0, 127], sizes = [8, 1], strides = [1, 1]} : vector<8x128xf32> to vector<8x1xf32>
    %10 = vector.extract_strided_slice %2 {offsets = [0, 0], sizes = [8, 127], strides = [1, 1]} : vector<8x128xf32> to vector<8x127xf32>
    %11 = tpu.concatenate %9, %10 in 1 : vector<8x1xf32>, vector<8x127xf32> -> vector<8x128xf32>
    %cst_5 = arith.constant 0.000000e+00 : f32
    %12 = vector.shape_cast %5 : vector<1x128xi1> to vector<1x128xi1>
    %13 = vector.broadcast %12 : vector<1x128xi1> to vector<8x128xi1>
    %14 = vector.broadcast %cst_5 : f32 to vector<8x128xf32>
    %15 = arith.select %13, %11, %14 : vector<8x128xi1>, vector<8x128xf32>
    %16 = vector.extract_strided_slice %2 {offsets = [0, 1], sizes = [8, 127], strides = [1, 1]} : vector<8x128xf32> to vector<8x127xf32>
    %17 = vector.extract_strided_slice %2 {offsets = [0, 0], sizes = [8, 1], strides = [1, 1]} : vector<8x128xf32> to vector<8x1xf32>
    %18 = tpu.concatenate %16, %17 in 1 : vector<8x127xf32>, vector<8x1xf32> -> vector<8x128xf32>
    %cst_6 = arith.constant 0.000000e+00 : f32
    %19 = vector.shape_cast %7 : vector<1x128xi1> to vector<1x128xi1>
    %20 = vector.broadcast %19 : vector<1x128xi1> to vector<8x128xi1>
    %21 = vector.broadcast %cst_6 : f32 to vector<8x128xf32>
    %22 = arith.select %20, %18, %21 : vector<8x128xi1>, vector<8x128xf32>
    %23 = tpu.concatenate %15, %2, %22 in 0 : vector<8x128xf32>, vector<8x128xf32>, vector<8x128xf32> -> vector<24x128xf32>
    %cst_7 = arith.constant dense<0.000000e+00> : vector<16x128xf32>
    %24 = tpu.matmul %8, %23, %cst_7 {dimension_numbers = #tpu.dot_dimension_numbers<[1], [0], [0], [1], [0, 0, 1, 1], [], []>} : vector<16x24xf32>, vector<24x128xf32>, vector<16x128xf32> -> vector<16x128xf32>
    %cst_8 = arith.constant 0.000000e+00 : f32
    %25 = vector.broadcast %cst_8 : f32 to vector<16x128xf32>
    %26 = arith.maximumf %24, %25 : vector<16x128xf32>
    %c0_9 = arith.constant 0 : index
    %c0_10 = arith.constant 0 : index
    %27 = vector.load %arg4[%c0_9, %c0_10] : memref<8x48xf32, #tpu.memory_space<vmem>>, vector<8x48xf32>
    %28 = vector.extract_strided_slice %26 {offsets = [0, 127], sizes = [16, 1], strides = [1, 1]} : vector<16x128xf32> to vector<16x1xf32>
    %29 = vector.extract_strided_slice %26 {offsets = [0, 0], sizes = [16, 127], strides = [1, 1]} : vector<16x128xf32> to vector<16x127xf32>
    %30 = tpu.concatenate %28, %29 in 1 : vector<16x1xf32>, vector<16x127xf32> -> vector<16x128xf32>
    %cst_11 = arith.constant 0.000000e+00 : f32
    %31 = vector.shape_cast %5 : vector<1x128xi1> to vector<1x128xi1>
    %32 = vector.broadcast %31 : vector<1x128xi1> to vector<16x128xi1>
    %33 = vector.broadcast %cst_11 : f32 to vector<16x128xf32>
    %34 = arith.select %32, %30, %33 : vector<16x128xi1>, vector<16x128xf32>
    %35 = vector.extract_strided_slice %26 {offsets = [0, 1], sizes = [16, 127], strides = [1, 1]} : vector<16x128xf32> to vector<16x127xf32>
    %36 = vector.extract_strided_slice %26 {offsets = [0, 0], sizes = [16, 1], strides = [1, 1]} : vector<16x128xf32> to vector<16x1xf32>
    %37 = tpu.concatenate %35, %36 in 1 : vector<16x127xf32>, vector<16x1xf32> -> vector<16x128xf32>
    %cst_12 = arith.constant 0.000000e+00 : f32
    %38 = vector.shape_cast %7 : vector<1x128xi1> to vector<1x128xi1>
    %39 = vector.broadcast %38 : vector<1x128xi1> to vector<16x128xi1>
    %40 = vector.broadcast %cst_12 : f32 to vector<16x128xf32>
    %41 = arith.select %39, %37, %40 : vector<16x128xi1>, vector<16x128xf32>
    %42 = tpu.concatenate %34, %26, %41 in 0 : vector<16x128xf32>, vector<16x128xf32>, vector<16x128xf32> -> vector<48x128xf32>
    %cst_13 = arith.constant dense<0.000000e+00> : vector<8x128xf32>
    %43 = tpu.matmul %27, %42, %cst_13 {dimension_numbers = #tpu.dot_dimension_numbers<[1], [0], [0], [1], [0, 0, 1, 1], [], []>} : vector<8x48xf32>, vector<48x128xf32>, vector<8x128xf32> -> vector<8x128xf32>
    %cst_14 = arith.constant 0.000000e+00 : f32
    %44 = vector.broadcast %cst_14 : f32 to vector<8x128xf32>
    %45 = arith.maximumf %43, %44 : vector<8x128xf32>
    %46 = vector.extract_strided_slice %45 {offsets = [0, 127], sizes = [8, 1], strides = [1, 1]} : vector<8x128xf32> to vector<8x1xf32>
    %47 = vector.extract_strided_slice %45 {offsets = [0, 0], sizes = [8, 127], strides = [1, 1]} : vector<8x128xf32> to vector<8x127xf32>
    %48 = tpu.concatenate %46, %47 in 1 : vector<8x1xf32>, vector<8x127xf32> -> vector<8x128xf32>
    %cst_15 = arith.constant 0.000000e+00 : f32
    %49 = vector.shape_cast %5 : vector<1x128xi1> to vector<1x128xi1>
    %50 = vector.broadcast %49 : vector<1x128xi1> to vector<8x128xi1>
    %51 = vector.broadcast %cst_15 : f32 to vector<8x128xf32>
    %52 = arith.select %50, %48, %51 : vector<8x128xi1>, vector<8x128xf32>
    %53 = vector.extract_strided_slice %45 {offsets = [0, 1], sizes = [8, 127], strides = [1, 1]} : vector<8x128xf32> to vector<8x127xf32>
    %54 = vector.extract_strided_slice %45 {offsets = [0, 0], sizes = [8, 1], strides = [1, 1]} : vector<8x128xf32> to vector<8x1xf32>
    %55 = tpu.concatenate %53, %54 in 1 : vector<8x127xf32>, vector<8x1xf32> -> vector<8x128xf32>
    %cst_16 = arith.constant 0.000000e+00 : f32
    %56 = vector.shape_cast %7 : vector<1x128xi1> to vector<1x128xi1>
    %57 = vector.broadcast %56 : vector<1x128xi1> to vector<8x128xi1>
    %58 = vector.broadcast %cst_16 : f32 to vector<8x128xf32>
    %59 = arith.select %57, %55, %58 : vector<8x128xi1>, vector<8x128xf32>
    %60 = tpu.concatenate %52, %45, %59 in 0 : vector<8x128xf32>, vector<8x128xf32>, vector<8x128xf32> -> vector<24x128xf32>
    %c0_17 = arith.constant 0 : index
    %c0_18 = arith.constant 0 : index
    %61 = vector.load %arg2[%c0_17, %c0_18] : memref<8x128xf32, #tpu.memory_space<vmem>>, vector<8x128xf32>
    %62 = vector.extract_strided_slice %61 {offsets = [0, 127], sizes = [8, 1], strides = [1, 1]} : vector<8x128xf32> to vector<8x1xf32>
    %63 = vector.extract_strided_slice %61 {offsets = [0, 0], sizes = [8, 127], strides = [1, 1]} : vector<8x128xf32> to vector<8x127xf32>
    %64 = tpu.concatenate %62, %63 in 1 : vector<8x1xf32>, vector<8x127xf32> -> vector<8x128xf32>
    %cst_19 = arith.constant 0.000000e+00 : f32
    %65 = vector.shape_cast %5 : vector<1x128xi1> to vector<1x128xi1>
    %66 = vector.broadcast %65 : vector<1x128xi1> to vector<8x128xi1>
    %67 = vector.broadcast %cst_19 : f32 to vector<8x128xf32>
    %68 = arith.select %66, %64, %67 : vector<8x128xi1>, vector<8x128xf32>
    %69 = vector.extract_strided_slice %61 {offsets = [0, 1], sizes = [8, 127], strides = [1, 1]} : vector<8x128xf32> to vector<8x127xf32>
    %70 = vector.extract_strided_slice %61 {offsets = [0, 0], sizes = [8, 1], strides = [1, 1]} : vector<8x128xf32> to vector<8x1xf32>
    %71 = tpu.concatenate %69, %70 in 1 : vector<8x127xf32>, vector<8x1xf32> -> vector<8x128xf32>
    %cst_20 = arith.constant 0.000000e+00 : f32
    %72 = vector.shape_cast %7 : vector<1x128xi1> to vector<1x128xi1>
    %73 = vector.broadcast %72 : vector<1x128xi1> to vector<8x128xi1>
    %74 = vector.broadcast %cst_20 : f32 to vector<8x128xf32>
    %75 = arith.select %73, %71, %74 : vector<8x128xi1>, vector<8x128xf32>
    %76 = tpu.concatenate %68, %61, %75 in 0 : vector<8x128xf32>, vector<8x128xf32>, vector<8x128xf32> -> vector<24x128xf32>
    %77 = tpu.concatenate %60, %76 in 0 : vector<24x128xf32>, vector<24x128xf32> -> vector<48x128xf32>
    %c0_21 = arith.constant 0 : index
    %c0_22 = arith.constant 0 : index
    %78 = vector.load %arg5[%c0_21, %c0_22] : memref<16x48xf32, #tpu.memory_space<vmem>>, vector<16x48xf32>
    %cst_23 = arith.constant dense<0.000000e+00> : vector<16x128xf32>
    %79 = tpu.matmul %78, %77, %cst_23 {dimension_numbers = #tpu.dot_dimension_numbers<[1], [0], [0], [1], [0, 0, 1, 1], [], []>} : vector<16x48xf32>, vector<48x128xf32>, vector<16x128xf32> -> vector<16x128xf32>
    %cst_24 = arith.constant 0.000000e+00 : f32
    %80 = vector.broadcast %cst_24 : f32 to vector<16x128xf32>
    %81 = arith.maximumf %79, %80 : vector<16x128xf32>
    %c0_25 = arith.constant 0 : index
    %c0_26 = arith.constant 0 : index
    %82 = vector.load %arg6[%c0_25, %c0_26] : memref<16x128xf32, #tpu.memory_space<vmem>>, vector<16x128xf32>
    tpu.vector_store %arg6[%c0_25, %c0_26], %81 {strides = array<i32>} : memref<16x128xf32, #tpu.memory_space<vmem>>, vector<16x128xf32>,
    return
  }
}

</mosaic_0001>

<bundles_post_ra>
// kernel: dct_block_forward.1
= control target key start
LH: loop header
LB: loop body
LE: loop exit
PB: predicated region body
PF: predicated region fallthrough
CT: control target
= control target key end

     0   :  { %11 = vsyncpa [#allocation3], 0  ;;  %s854_s0 = inlined_call_operand.vmem [shape: f32[8,256], index: 0, kind: input, shape index: {}]   ;;  %s855_s1 = inlined_call_operand.hbm [shape: f32[256,128], index: 1, kind: input, shape index: {}]   ;;  %s856_s2 = inlined_call_operand.vmem [shape: f32[8,128], index: 2, kind: input, shape index: {}]   ;;  %s857_s3 = inlined_call_operand.vmem [shape: f32[16,24], index: 3, kind: input, shape index: {}]   ;;  %s858_s4 = inlined_call_operand.vmem [shape: f32[8,48], index: 4, kind: input, shape index: {}]   ;;  %s859_s5 = inlined_call_operand.vmem [shape: f32[16,48], index: 5, kind: input, shape index: {}]   ;;  %s860_s6 = inlined_call_operand.hbm [shape: f32[16,128], index: 6, kind: output, shape index: {}]  }
   0x1   :  { %12 = vsyncpa [#allocation4], 0  ;;  %s706_s21 = smov [#allocation2]   ;;  %s658_s25 = scalar_lea.hbm %s855_s1, 4096 }
   0x2   :  { %s20_s22 = sshll.u32 %s706_s21, 4  ;;  %p659_p0 = scmp.ne.s32.totalorder %s855_s1, %s658_s25  ;;  %s21_s22 = int_to_ptr.vmem [resolvable:$true] %s20_s22 }
   0x3   :  { %p662_p1 = scmp.lt.u32.totalorder %s658_s25, %s855_s1 }
   0x5   :  { %p664_p2 = pnand %p662_p1, %p659_p0 }
   0x7   :  { %667 = shalt.err (!%p664_p2)
}
   0x8   :  { %s668_s30 = scalar_lea.vmem %s21_s22, 4096  ;;  %p673_p4 = scmp.lt.s32.totalorder %s21_s22, %s21_s22 }
   0x9   :  { %p669_p3 = scmp.ne.s32.totalorder %s21_s22, %s668_s30  ;;  %p674_p5 = scmp.lt.s32.totalorder %s668_s30, %s668_s30 }
   0xb   :  { %p675_p6 = por %p674_p5, %p673_p4 }
   0xd   :  { %p676_p7 = pnand %p675_p6, %p669_p3 }
   0xf   :  { %679 = shalt.err (!%p676_p7)
}
  0x10   :  { %s707_s7 = smov 128   ;;  %s708_s8 = smov 8  }
  0x11   :  { %26 = dma.hbm_to_vmem [thread:$0]  %s855_s1, 4096, %s21_s22, [#allocation3], %s707_s7, %s707_s7, %s708_s8  }
  0x12   :  { %702 = dma.done.wait [#allocation3], 4096  }
  0x13   :  { %703 = vsyncadd [#allocation3], 4294963200  ;;  %v56_v0 = vld [vmem:[#allocation2 + $0x80] sm:$0xff]  ;;  %v57_v1 = vld [vmem:[#allocation2 + $0x88] sm:$0xff]  ;;  %vm161_vm0 = vcmask 195584   ;;  %s709_s16 = smov 1   ;;  %v142_v54 = vlaneseq }
  0x14   :  { %v40_v2 = vld [vmem:[#allocation2] sm:$0xff]  ;;  %v571_v3 = vpack.c.bf16 %v57_v1, %v56_v0  ;;  %v41_v4 = vld [vmem:[#allocation2 + $0x8] sm:$0xff]  ;;  %v58_v5 = vld [vmem:[#allocation2 + $0x90] sm:$0xff]  ;;  %s710_s17 = smov 127   ;;  %vm711_vm2 = vmmov 1   ;;  %v712_v61 = vmov 0.0|0.0  }
  0x15   :  { %v59_v6 = vld [vmem:[#allocation2 + $0x98] sm:$0xff]  ;;  %v573_v7 = vpack.c.bf16 %v41_v4, %v40_v2  ;;  %v42_v9 = vld [vmem:[#allocation2 + $0x10] sm:$0xff]  ;;  %v60_v11 = vld [vmem:[#allocation2 + $0xa0] sm:$0xff]  ;;  %v778_v55 = vand.u32 127, %v142_v54  ;;  %vm713_vm5 = vmmov 0   ;;  %v714_v4 = vmov 0.0  }
  0x16   :  { %v575_v8 = vpack.c.bf16 %v59_v6, %v58_v5  ;;  %v43_v10 = vld [vmem:[#allocation2 + $0x18] sm:$0xff]  ;;  %572 = vmatprep.subr.bf16.mxu0 %v571_v3  ;;  %v61_v12 = vld [vmem:[#allocation2 + $0xa8] sm:$0xff]  ;;  %v44_v15 = vld [vmem:[#allocation2 + $0x20] sm:$0xff]  ;;  %vm264_vm8 = vcmask 392192   ;;  %s715_s24 = smov [#allocation5]  }
  0x17   :  { %574 = vmatpush3.bf16.msra.mxu0 %v573_v7  ;;  %v577_v13 = vpack.c.bf16 %v43_v10, %v42_v9  ;;  %v579_v14 = vpack.c.bf16 %v61_v12, %v60_v11  ;;  %v45_v16 = vld [vmem:[#allocation2 + $0x28] sm:$0xff]  ;;  %v62_v17 = vld [vmem:[#allocation2 + $0xb0] sm:$0xff]  ;;  %v63_v18 = vld [vmem:[#allocation2 + $0xb8] sm:$0xff]  ;;  %vm144_vm1 = vcmp.ne.s32.totalorder %v778_v55, 0  ;;  %vm145_vm4 = vcmp.ne.s32.totalorder %v778_v55, 127  ;;  %s450_s25 = sshll.u32 %s715_s24, 4  ;;  %s451_s25 = int_to_ptr.vmem [resolvable:$true] %s450_s25 }
  0x18   :  { %576 = vmatprep.subr.bf16.mxu0 %v575_v8  ;;  %v581_v19 = vpack.c.bf16 %v45_v16, %v44_v15  ;;  %v583_v20 = vpack.c.bf16 %v63_v18, %v62_v17  ;;  %v46_v21 = vld [vmem:[#allocation2 + $0x30] sm:$0xff]  ;;  %v47_v22 = vld [vmem:[#allocation2 + $0x38] sm:$0xff]  ;;  %v64_v23 = vld [vmem:[#allocation2 + $0xc0] sm:$0xff]  ;;  %s680_s26 = scalar_lea.vmem %s451_s25, 256  ;;  %p685_p9 = scmp.lt.s32.totalorder %s451_s25, %s451_s25 }
  0x19   :  { %v65_v24 = vld [vmem:[#allocation2 + $0xc8] sm:$0xff]  ;;  %v585_v26 = vpack.c.bf16 %v47_v22, %v46_v21  ;;  %v48_v28 = vld [vmem:[#allocation2 + $0x40] sm:$0xff]  ;;  %v66_v30 = vld [vmem:[#allocation2 + $0xd0] sm:$0xff]  ;;  %p681_p8 = scmp.ne.s32.totalorder %s451_s25, %s680_s26  ;;  %p686_p10 = scmp.lt.s32.totalorder %s680_s26, %s680_s26 }
  0x1a   :  { %v39_v25 = vld [vmem:[%s854_s0 + $0x8] sm:$0xff]  ;;  %v587_v27 = vpack.c.bf16 %v65_v24, %v64_v23  ;;  %v67_v31 = vld [vmem:[#allocation2 + $0xd8] sm:$0xff]  ;;  %v50_v34 = vld [vmem:[#allocation2 + $0x50] sm:$0xff] }
  0x1b   :  { %578 = vmatpush3.bf16.msra.mxu0 %v577_v13  ;;  %136 = vmatprep.mubr.f32.mxu0 %v39_v25  ;;  %v49_v29 = vld [vmem:[#allocation2 + $0x48] sm:$0xff]  ;;  %v591_v33 = vpack.c.bf16 %v67_v31, %v66_v30  ;;  %v51_v35 = vld [vmem:[#allocation2 + $0x58] sm:$0xff]  ;;  %v68_v36 = vld [vmem:[#allocation2 + $0xe0] sm:$0xff]  ;;  %p687_p11 = por %p686_p10, %p685_p9 }
  0x1c   :  { %580 = vmatprep.subr.bf16.mxu0 %v579_v14  ;;  %v589_v32 = vpack.c.bf16 %v49_v29, %v48_v28  ;;  %v69_v37 = vld [vmem:[#allocation2 + $0xe8] sm:$0xff]  ;;  %v593_v38 = vpack.c.bf16 %v51_v35, %v50_v34  ;;  %v52_v40 = vld [vmem:[#allocation2 + $0x60] sm:$0xff]  ;;  %v70_v42 = vld [vmem:[#allocation2 + $0xf0] sm:$0xff] }
  0x1d   :  { %v595_v39 = vpack.c.bf16 %v69_v37, %v68_v36  ;;  %v53_v41 = vld [vmem:[#allocation2 + $0x68] sm:$0xff]  ;;  %v71_v43 = vld [vmem:[#allocation2 + $0xf8] sm:$0xff]  ;;  %v54_v46 = vld [vmem:[#allocation2 + $0x70] sm:$0xff]  ;;  %p688_p12 = pnand %p687_p11, %p681_p8 }
  0x1e   :  { %v597_v44 = vpack.c.bf16 %v53_v41, %v52_v40  ;;  %v599_v45 = vpack.c.bf16 %v71_v43, %v70_v42  ;;  %v55_v47 = vld [vmem:[#allocation2 + $0x78] sm:$0xff]  ;;  %v38_v49 = vld [vmem:[%s854_s0] sm:$0xff]  ;;  %vm784_vm3 = vmpackc.low %vm711_vm2, %vm144_vm1 }
  0x1f   :  { %582 = vmatpush3.bf16.msra.mxu0 %v581_v19  ;;  %v601_v48 = vpack.c.bf16 %v55_v47, %v54_v46  ;;  %v146_v50 = vld [vmem:[%s857_s3] sm:$0xff]  ;;  %v147_v60 = vld [vmem:[%s857_s3 + $0x8] sm:$0xff]  ;;  %vm611_vm6 = vmpackc.low %vm144_vm1, %vm144_vm1 }
  0x20   :  { %584 = vmatprep.subr.bf16.mxu0 %v583_v20  ;;  %538 = vmatprep.mubr.msk.f32.mxu1 %vm161_vm0, %v146_v50  ;;  %vm618_vm7 = vmpackc.low %vm145_vm4, %vm145_vm4  ;;  %v245_v13 = vld [vmem:[%s858_s4] sm:$0xff] }
  0x21   :  { %v358_v17 = vld [vmem:[%s859_s5] sm:$0xff]  ;;  %vm627_vm9 = vmpackc.low %vm144_vm1, %vm145_vm4 }
  0x22   :  { %v348_v18 = vld [vmem:[%s856_s2] sm:$0xff]  ;;  %vm633_vm10 = vmpackc.low %vm145_vm4, %vm711_vm2 }
  0x23   :  { %586 = vmatpush3.bf16.msra.mxu0 %v585_v26  ;;  %v359_v26 = vld [vmem:[%s859_s5 + $0x8] sm:$0xff] }
  0x24   :  { %588 = vmatprep.subr.bf16.mxu0 %v587_v27 }
  0x27   :  { %590 = vmatpush3.bf16.msra.mxu0 %v589_v32 }
  0x28   :  { %592 = vmatprep.subr.bf16.mxu0 %v591_v33 }
  0x2b   :  { %594 = vmatpush3.bf16.msra.mxu0 %v593_v38 }
  0x2c   :  { %596 = vmatprep.subr.bf16.mxu0 %v595_v39 }
  0x2f   :  { %598 = vmatpush3.bf16.msra.mxu0 %v597_v44 }
  0x30   :  { %600 = vmatprep.subr.bf16.mxu0 %v599_v45 }
  0x33   :  { %602 = vmatpush3.bf16.msra.mxu0 %v601_v48 }
  0x36   :  { %137 = vmatmul.mubr.f32.vlgmr.msra.gmra.mrb[0].mxu0 %v38_v49 }
 0x109   :  { %v509_v51 = vpop.f32.mrb[0].mxu0 }
 0x10a   :  { %v510_v52 = vpop.f32.mrb[1].mxu0 }
 0x10b   :  { %v511_v53 = vadd.f32 %v510_v52, %v509_v51 }
 0x10d   :  { %149 = vrot.lane.b32.xlu0 %v511_v53, %s709_s16 }
 0x111   :  { %155 = vrot.lane.b32.xlu0 %v511_v53, %s710_s17 }
 0x17f   :  { %v150_v56 = vpop.permute.xlu0 %149 }
 0x180   :  { %v603_v58 = vpack.c.bf16 %v511_v53, %v150_v56 }
 0x182   :  { %605 = vmatprep.subr.msk.bf16.mxu1 %vm784_vm3, %v603_v58 }
 0x183   :  { %608 = vmatpush3.bf16.msk.msra.mxu1 %vm784_vm3, %v603_v58  ;;  %v156_v59 = vpop.permute.xlu0 %155 }
 0x184   :  { %536 = vmatprep.subr.msk.mxu1 %vm145_vm4, %v156_v59 }
 0x187   :  { %537 = vmatpush3.msk.msra.mxu1 %vm145_vm4, %v156_v59 }
 0x188   :  { %539 = vmatmul.mubr.msk.f32.vlgmr.msra.gmra.mrb[0].mxu1 %vm161_vm0, %v147_v60  ;;  %609 = vmatprep.subr.bf16.mxu1 %v712_v61 }
 0x189   :  { %553 = vmatprep.mubr.msk.f32.mxu1 %vm713_vm5, %v714_v4 }
 0x25b   :  { %v540_v62 = vpop.f32.mrb[0].mxu1 }
 0x25c   :  { %v244_v63 = vmax.f32 %v540_v62, 0.0  ;;  %v234_v0 = vpop.f32.mrb[1].mxu1 }
 0x25d   :  { %v243_v1 = vmax.f32 %v234_v0, 0.0 }
 0x25f   :  { %v614_v2 = vpack.c.bf16 %v244_v63, %v243_v1  ;;  %v648_v3 = vpack.i.bf16 %v244_v63, %v243_v1 }
 0x261   :  { %649 = vrot.lane.b32.xlu1 %v648_v3, %s709_s16 }
 0x265   :  { %654 = vrot.lane.b32.xlu1 %v648_v3, %s710_s17 }
 0x2d3   :  { %v650_v5 = vpop.permute.xlu1 %649 }
 0x2d4   :  { %v652_v6 = vunpack.i.h.bf16 %v650_v5  ;;  %v651_v7 = vunpack.i.l.bf16 %v650_v5 }
 0x2d6   :  { %v610_v8 = vpack.c.bf16 %v652_v6, %v651_v7 }
 0x2d7   :  { %v655_v9 = vpop.permute.xlu1 %654 }
 0x2d8   :  { %612 = vmatpush3.bf16.msk.msra.mxu1 %vm611_vm6, %v610_v8  ;;  %v657_v10 = vunpack.i.h.bf16 %v655_v9  ;;  %v656_v11 = vunpack.i.l.bf16 %v655_v9 }
 0x2d9   :  { %613 = vmatprep.subr.bf16.mxu1 %v712_v61 }
 0x2da   :  { %v617_v12 = vpack.c.bf16 %v657_v10, %v656_v11 }
 0x2dc   :  { %615 = vmatpush3.bf16.msra.mxu1 %v614_v2 }
 0x2dd   :  { %616 = vmatprep.subr.bf16.mxu1 %v712_v61 }
 0x2e0   :  { %619 = vmatpush3.bf16.msk.msra.mxu1 %vm618_vm7, %v617_v12 }
 0x2e3   :  { %554 = vmatmul.mubr.msk.f32.vlgmr.msra.gmra.mrb[2].mxu1 %vm264_vm8, %v245_v13 }
 0x2e4   :  { %568 = vmatprep.mubr.msk.f32.mxu1 %vm264_vm8, %v358_v17 }
 0x3b6   :  { %v334_v14 = vpop.f32.mrb[2].mxu1 }
 0x3b7   :  { %v338_v15 = vmax.f32 %v334_v14, 0.0  ;;  %v555_v16 = vpop.f32.mrb[3].mxu1 }
 0x3b9   :  { %344 = vrot.lane.b32.xlu1 %v338_v15, %s710_s17  ;;  %340 = vrot.lane.b32.xlu0 %v338_v15, %s709_s16 }
 0x3bd   :  { %350 = vrot.lane.b32.xlu0 %v348_v18, %s709_s16  ;;  %354 = vrot.lane.b32.xlu1 %v348_v18, %s710_s17 }
 0x42b   :  { %v345_v19 = vpop.permute.xlu1 %344  ;;  %v341_v20 = vpop.permute.xlu0 %340 }
 0x42c   :  { %v620_v21 = vpack.c.bf16 %v338_v15, %v341_v20 }
 0x42e   :  { %622 = vmatprep.subr.msk.bf16.mxu1 %vm784_vm3, %v620_v21 }
 0x42f   :  { %625 = vmatpush3.bf16.msk.msra.mxu1 %vm784_vm3, %v620_v21  ;;  %v351_v22 = vpop.permute.xlu0 %350  ;;  %v355_v23 = vpop.permute.xlu1 %354 }
 0x430   :  { %v626_v24 = vpack.c.bf16 %v351_v22, %v345_v19  ;;  %v632_v25 = vpack.c.bf16 %v355_v23, %v348_v18 }
 0x432   :  { %628 = vmatprep.subr.msk.bf16.mxu1 %vm627_vm9, %v626_v24 }
 0x433   :  { %631 = vmatpush3.bf16.msk.msra.mxu1 %vm627_vm9, %v626_v24 }
 0x434   :  { %634 = vmatprep.subr.msk.bf16.mxu1 %vm633_vm10, %v632_v25 }
 0x437   :  { %637 = vmatpush3.bf16.msk.msra.mxu1 %vm633_vm10, %v632_v25 }
 0x43a   :  { %569 = vmatmul.mubr.msk.f32.vlgmr.msra.gmra.mrb[4].mxu1 %vm264_vm8, %v359_v26 }
 0x50d   :  { %v570_v27 = vpop.f32.mrb[4].mxu1 }
 0x50e   :  { %v442_v28 = vmax.f32 %v570_v27, 0.0  ;;  %v432_v29 = vpop.f32.mrb[5].mxu1 }
 0x50f   :  { %v441_v30 = vmax.f32 %v432_v29, 0.0 }
 0x510   :  { %444 = vst [vmem:[#allocation5 + $0x8] sm:$0xff] %v442_v28 }
 0x511   :  { %443 = vst [vmem:[#allocation5] sm:$0xff] %v441_v30 }
 0x512   :  { %691 = shalt.err (!%p688_p12)
}
 0x513   :  { %s692_s28 = scalar_lea.hbm %s860_s6, 256 }
 0x514   :  { %p693_p13 = scmp.ne.s32.totalorder %s860_s6, %s692_s28  ;;  %p696_p0 = scmp.lt.u32.totalorder %s692_s28, %s860_s6 }
 0x516   :  { %p698_p1 = pnand %p696_p0, %p693_p13 }
 0x518   :  { %701 = shalt.err (!%p698_p1)
}
 0x519   :  { %456 = dma.vmem_to_hbm [thread:$0]  %s451_s25, 256, %s860_s6, [#allocation4], %s707_s7, %s707_s7, %s708_s8  }
 0x51a   :  { %704 = dma.done.wait [#allocation4], 256  }
 0x51b   :  { %705 = vsyncadd [#allocation4], 4294967040 }
 0x51c   :  { %460 = vsyncpa [#allocation3], 1 }
 0x51d   :  { %461 = vsyncpa [#allocation4], 1 }

</bundles_post_ra>
